<compile_context>
chip_gen: v7x
topology: tpu7x:2x2x1
jax: 0.10.0
libtpu: 0.0.40
codegen_flags: <defaults>
</compile_context>

<pallas_src>
import functools

import jax
import jax.numpy as jnp
from jax.experimental import pallas as pl
from jax.experimental.pallas import tpu as pltpu


def _round_up(x, m):
    return ((x + m - 1) // m) * m


def textcnn_kernel(kmax, vocab_size,
                   codes_ref, ew_ref, cb_ref, mask_ref, fcw_ref, fcb_ref,
                   out_ref):
    """One batch tile.

    codes_ref : (TB, L, kmax) int32, codes[b,t,j] = j*V + token[b, (t+j) % L]
    ew_ref    : (kmax*V, NF) bf16, folded  emb @ conv_w  per tap / kernel size
    cb_ref    : (1, NF) f32 conv bias (zero in padded filter columns)
    mask_ref  : (L, NF) f32 additive time-validity mask (0 or -1e30)
    fcw_ref   : (NF, Cp) bf16, fc weight (zero-padded rows/cols)
    fcb_ref   : (1, Cp) f32 fc bias
    out_ref   : (TB, Cp) f32 logits (padded classes sliced off in the wrapper)
    """
    codes = codes_ref[...]                       # (TB, L, kmax)
    TB, L, _ = codes.shape
    KV = kmax * vocab_size

    # Multi-hot "token-tap" encoding: oh[b, t, j*V + v] = (token[b,t+j] == v).
    # Built with kmax cheap VPU compares; the code blocks are disjoint so a
    # plain select-accumulate is exact.
    iota_c = jax.lax.broadcasted_iota(jnp.int32, (TB, L, KV), 2)
    oh_f = jnp.where(codes[:, :, 0:1] == iota_c, 1.0, 0.0)
    for j in range(1, kmax):
        oh_f = jnp.where(codes[:, :, j:j + 1] == iota_c, 1.0, oh_f)
    oh = oh_f.astype(jnp.bfloat16)               # (TB, L, KV) bf16 MXU operand

    # Single fused contraction = embedding lookup + every conv tap of every
    # kernel size at once (K = kmax*V, N = NF, bf16 in / f32 accumulate).
    acc = jax.lax.dot_general(
        oh, ew_ref[...],
        dimension_numbers=(((2,), (0,)), ((), ())),
        preferred_element_type=jnp.float32)      # (TB, L, NF) f32

    bias = cb_ref[...]                           # read once per tile
    acc = jnp.maximum(acc + bias, 0.0)           # conv bias + ReLU (f32)
    acc = acc + mask_ref[...][None, :, :]        # -1e30 at invalid time steps
    pooled = jnp.max(acc, axis=1)                # (TB, NF) max-pool over time

    # TODO(synk): nn.Dropout is treated as inference-mode identity (no RNG mask).

    logits = jax.lax.dot_general(
        pooled.astype(jnp.bfloat16), fcw_ref[...],
        dimension_numbers=(((1,), (0,)), ((), ())),
        preferred_element_type=jnp.float32) + fcb_ref[...]
    out_ref[...] = logits.astype(out_ref.dtype)


def textcnn_forward(tokens, params, kernel_sizes, num_filters, *, block_b=8):
    emb = params["embedding"].astype(jnp.float32)          # (V, E)
    V, E = emb.shape
    F = num_filters
    nk = len(kernel_sizes)
    kmax = max(kernel_sizes)
    B, L = tokens.shape
    C = params["fc_w"].shape[1]

    NF = _round_up(nk * F, 128)        # lane-dense packed filter block
    Cp = _round_up(C, 128)             # lane-dense class block
    KV = kmax * V                      # fused contraction dim (taps x vocab)

    # ---- one-time constant folding of weights (plain JAX, outside kernel) ----
    # ew[j*V + v, i*F + f] = sum_e emb[v, e] * conv_w_i[j, e, f]
    ew = jnp.zeros((KV, NF), jnp.float32)
    cb = jnp.zeros((1, NF), jnp.float32)
    tmask = jnp.zeros((L, NF), jnp.float32)
    for i, k in enumerate(kernel_sizes):
        w_i = params["conv_w"][i].astype(jnp.float32)      # (k, E, F)
        ew_i = jnp.einsum("ve,kef->kvf", emb, w_i).reshape(k * V, F)
        ew = ew.at[:k * V, i * F:(i + 1) * F].set(ew_i)
        cb = cb.at[:, i * F:(i + 1) * F].set(params["conv_b"][i].astype(jnp.float32))
        t_valid = L - k + 1
        col = jnp.where(jnp.arange(L) < t_valid, 0.0, -1e30).astype(jnp.float32)
        tmask = tmask.at[:, i * F:(i + 1) * F].set(col[:, None])
    fcw = jnp.zeros((NF, Cp), jnp.float32).at[:nk * F, :C].set(
        params["fc_w"].astype(jnp.float32))
    fcb = jnp.zeros((1, Cp), jnp.float32).at[:, :C].set(
        params["fc_b"].astype(jnp.float32))

    ew = ew.astype(jnp.bfloat16)       # bf16 MXU operands, f32 accumulation
    fcw = fcw.astype(jnp.bfloat16)

    # ---- per-example token-tap codes (replaces the (B,L,E) HBM activation) ----
    tok = tokens.astype(jnp.int32)
    codes = jnp.stack(
        [j * V + jnp.roll(tok, -j, axis=1) for j in range(kmax)], axis=-1
    ).astype(jnp.int32)                                    # (B, L, kmax)

    # batch tiling: sublane-aligned tile, padded batch, pipelined grid
    TB = _round_up(min(block_b, _round_up(B, 8)), 8)
    Bp = _round_up(B, TB)
    if Bp != B:
        codes = jnp.pad(codes, ((0, Bp - B), (0, 0), (0, 0)))
    grid = (Bp // TB,)

    # explicit VMEM budget: resident weights + double-buffered codes/out blocks
    resident = (ew.size * 2 + cb.size * 4 + tmask.size * 4 +
                fcw.size * 2 + fcb.size * 4)
    per_step = 2 * (TB * L * kmax * 4 + TB * Cp * 4)
    scratch = TB * L * KV * (2 + 4) + 2 * TB * L * NF * 4
    vmem_bytes = int(min(32 * 2**20, max(4 * 2**20,
                                         2 * (resident + per_step + scratch))))

    kernel = functools.partial(textcnn_kernel, kmax, V)

    out = pl.pallas_call(
        kernel,
        out_shape=jax.ShapeDtypeStruct((Bp, Cp), jnp.float32),
        grid=grid,
        in_specs=[
            pl.BlockSpec((TB, L, kmax), lambda b: (b, 0, 0)),  # batch-tiled codes
            pl.BlockSpec((KV, NF), lambda b: (0, 0)),          # VMEM-resident weights
            pl.BlockSpec((1, NF), lambda b: (0, 0)),
            pl.BlockSpec((L, NF), lambda b: (0, 0)),
            pl.BlockSpec((NF, Cp), lambda b: (0, 0)),
            pl.BlockSpec((1, Cp), lambda b: (0, 0)),
        ],
        out_specs=pl.BlockSpec((TB, Cp), lambda b: (b, 0)),
        compiler_params=pltpu.CompilerParams(
            dimension_semantics=("parallel",),   # shard batch tiles across TCs (v7x)
            vmem_limit_bytes=vmem_bytes),
    )(codes, ew, cb, tmask, fcw, fcb)

    return out[:B, :C]


def textcnn_reference(tokens, params, kernel_sizes, num_filters):
    """Pure-JAX f32 reference mirroring the PyTorch forward (dropout = eval mode)."""
    x = jnp.take(params["embedding"], tokens, axis=0).astype(jnp.float32)  # (B,L,E)
    pooled = []
    for i, k in enumerate(kernel_sizes):
        w = params["conv_w"][i]                                # (k, E, F)
        b = params["conv_b"][i]                                # (1, F)
        T = x.shape[1] - k + 1
        acc = jnp.zeros((x.shape[0], T, num_filters), jnp.float32)
        for j in range(k):
            acc = acc + jnp.einsum("bte,ef->btf", x[:, j:j + T, :], w[j])
        acc = jax.nn.relu(acc + b)
        pooled.append(jnp.max(acc, axis=1))
    feat = jnp.concatenate(pooled, axis=1)
    return feat @ params["fc_w"] + params["fc_b"]


def init_params(key, vocab_size, embed_size, num_classes, kernel_sizes, num_filters):
    keys = jax.random.split(key, 2 + 2 * len(kernel_sizes) + 2)
    emb = jax.random.normal(keys[0], (vocab_size, embed_size), jnp.float32) * 0.1
    emb = emb.at[0].set(0.0)                                   # padding_idx=0
    conv_w, conv_b = [], []
    for i, k in enumerate(kernel_sizes):
        conv_w.append(jax.random.normal(
            keys[1 + 2 * i], (k, embed_size, num_filters), jnp.float32) * 0.1)
        conv_b.append(jax.random.normal(
            keys[2 + 2 * i], (1, num_filters), jnp.float32) * 0.1)
    fc_w = jax.random.normal(
        keys[-2], (num_filters * len(kernel_sizes), num_classes), jnp.float32) * 0.1
    fc_b = jax.random.normal(keys[-1], (1, num_classes), jnp.float32) * 0.1
    return {"embedding": emb, "conv_w": conv_w, "conv_b": conv_b,
            "fc_w": fc_w, "fc_b": fc_b}


if __name__ == "__main__":
    vocab_size, embed_size, num_classes = 32, 32, 4
    kernel_sizes, num_filters = (2, 3, 4), 8
    batch, seq_len = 16, 16          # batch=16 with block_b=8 -> 2 pipelined tiles

    root = jax.random.PRNGKey(0)
    k_tok, k_par = jax.random.split(root)
    tokens = jax.random.randint(k_tok, (batch, seq_len), 0, vocab_size,
                                dtype=jnp.int32)
    params = init_params(k_par, vocab_size, embed_size, num_classes,
                         kernel_sizes, num_filters)

    out = textcnn_forward(tokens, params, kernel_sizes, num_filters, block_b=8)
    out = jax.block_until_ready(out)

    ref = textcnn_reference(tokens, params, kernel_sizes, num_filters)
    assert out.shape == (batch, num_classes)
    assert jnp.allclose(out, ref, atol=3e-2, rtol=3e-2), \
        f"max abs err {jnp.max(jnp.abs(out - ref))}"
    print("KERNEL_OK")
</pallas_src>

<mosaic_0001>
module attributes {stable_mosaic.version = 11 : i64} {
  func.func @textcnn_kernel(%arg0: i32, %arg1: memref<8x16x4xi32, #tpu.memory_space<vmem>>, %arg2: memref<128x128xbf16, #tpu.memory_space<vmem>>, %arg3: memref<1x128xf32, #tpu.memory_space<vmem>>, %arg4: memref<16x128xf32, #tpu.memory_space<vmem>>, %arg5: memref<128x128xbf16, #tpu.memory_space<vmem>>, %arg6: memref<1x128xf32, #tpu.memory_space<vmem>>, %arg7: memref<8x128xf32, #tpu.memory_space<vmem>>) attributes {dimension_semantics = [#tpu.dimension_semantics<parallel>], iteration_bounds = array<i64: 2>, scalar_prefetch = 0 : i64, scratch_operands = 0 : i64, tpu.core_type = #tpu.core_type<tc>, window_params = [{transform_indices = @transform_0, window_bounds = array<i64: 8, 16, 4>}, {pipeline_mode = #tpu.pipeline_mode<synchronous>, transform_indices = @transform_1, window_bounds = array<i64: 128, 128>}, {pipeline_mode = #tpu.pipeline_mode<synchronous>, transform_indices = @transform_2, window_bounds = array<i64: 1, 128>}, {pipeline_mode = #tpu.pipeline_mode<synchronous>, transform_indices = @transform_3, window_bounds = array<i64: 16, 128>}, {pipeline_mode = #tpu.pipeline_mode<synchronous>, transform_indices = @transform_4, window_bounds = array<i64: 128, 128>}, {pipeline_mode = #tpu.pipeline_mode<synchronous>, transform_indices = @transform_5, window_bounds = array<i64: 1, 128>}, {transform_indices = @transform_6, window_bounds = array<i64: 8, 128>}]} {
    %c0 = arith.constant 0 : index
    %c0_0 = arith.constant 0 : index
    %c0_1 = arith.constant 0 : index
    %0 = vector.load %arg1[%c0, %c0_0, %c0_1] : memref<8x16x4xi32, #tpu.memory_space<vmem>>, vector<8x16x4xi32>
    %1 = tpu.iota {dimensions = array<i32: 2>} : vector<8x16x128xi32>
    %2 = vector.extract_strided_slice %0 {offsets = [0, 0, 0], sizes = [8, 16, 1], strides = [1, 1, 1]} : vector<8x16x4xi32> to vector<8x16x1xi32>
    %3 = vector.broadcast %2 : vector<8x16x1xi32> to vector<8x16x128xi32>
    %4 = arith.cmpi eq, %3, %1 : vector<8x16x128xi32>
    %cst = arith.constant 1.000000e+00 : f32
    %cst_2 = arith.constant 0.000000e+00 : f32
    %5 = vector.broadcast %cst : f32 to vector<8x16x128xf32>
    %6 = vector.broadcast %cst_2 : f32 to vector<8x16x128xf32>
    %7 = arith.select %4, %5, %6 : vector<8x16x128xi1>, vector<8x16x128xf32>
    %8 = vector.extract_strided_slice %0 {offsets = [0, 0, 1], sizes = [8, 16, 1], strides = [1, 1, 1]} : vector<8x16x4xi32> to vector<8x16x1xi32>
    %9 = vector.broadcast %8 : vector<8x16x1xi32> to vector<8x16x128xi32>
    %10 = arith.cmpi eq, %9, %1 : vector<8x16x128xi32>
    %cst_3 = arith.constant 1.000000e+00 : f32
    %11 = vector.broadcast %cst_3 : f32 to vector<8x16x128xf32>
    %12 = arith.select %10, %11, %7 : vector<8x16x128xi1>, vector<8x16x128xf32>
    %13 = vector.extract_strided_slice %0 {offsets = [0, 0, 2], sizes = [8, 16, 1], strides = [1, 1, 1]} : vector<8x16x4xi32> to vector<8x16x1xi32>
    %14 = vector.broadcast %13 : vector<8x16x1xi32> to vector<8x16x128xi32>
    %15 = arith.cmpi eq, %14, %1 : vector<8x16x128xi32>
    %cst_4 = arith.constant 1.000000e+00 : f32
    %16 = vector.broadcast %cst_4 : f32 to vector<8x16x128xf32>
    %17 = arith.select %15, %16, %12 : vector<8x16x128xi1>, vector<8x16x128xf32>
    %18 = vector.extract_strided_slice %0 {offsets = [0, 0, 3], sizes = [8, 16, 1], strides = [1, 1, 1]} : vector<8x16x4xi32> to vector<8x16x1xi32>
    %19 = vector.broadcast %18 : vector<8x16x1xi32> to vector<8x16x128xi32>
    %20 = arith.cmpi eq, %19, %1 : vector<8x16x128xi32>
    %cst_5 = arith.constant 1.000000e+00 : f32
    %21 = vector.broadcast %cst_5 : f32 to vector<8x16x128xf32>
    %22 = arith.select %20, %21, %17 : vector<8x16x128xi1>, vector<8x16x128xf32>
    %23 = arith.truncf %22 : vector<8x16x128xf32> to vector<8x16x128xbf16>
    %c0_6 = arith.constant 0 : index
    %c0_7 = arith.constant 0 : index
    %24 = vector.load %arg2[%c0_6, %c0_7] : memref<128x128xbf16, #tpu.memory_space<vmem>>, vector<128x128xbf16>
    %cst_8 = arith.constant dense<0.000000e+00> : vector<8x16x128xf32>
    %25 = tpu.matmul %23, %24, %cst_8 {dimension_numbers = #tpu.dot_dimension_numbers<[2], [0], [0, 1], [1], [0, 0, 0, 1, 1, 1], [], []>} : vector<8x16x128xbf16>, vector<128x128xbf16>, vector<8x16x128xf32> -> vector<8x16x128xf32>
    %c0_9 = arith.constant 0 : index
    %c0_10 = arith.constant 0 : index
    %26 = vector.load %arg3[%c0_9, %c0_10] : memref<1x128xf32, #tpu.memory_space<vmem>>, vector<1x128xf32>
    %27 = vector.shape_cast %26 : vector<1x128xf32> to vector<1x1x128xf32>
    %28 = vector.broadcast %27 : vector<1x1x128xf32> to vector<8x16x128xf32>
    %29 = arith.addf %25, %28 : vector<8x16x128xf32>
    %cst_11 = arith.constant 0.000000e+00 : f32
    %30 = vector.broadcast %cst_11 : f32 to vector<8x16x128xf32>
    %31 = arith.maximumf %29, %30 : vector<8x16x128xf32>
    %c0_12 = arith.constant 0 : index
    %c0_13 = arith.constant 0 : index
    %32 = vector.load %arg4[%c0_12, %c0_13] : memref<16x128xf32, #tpu.memory_space<vmem>>, vector<16x128xf32>
    %33 = vector.shape_cast %32 : vector<16x128xf32> to vector<1x16x128xf32>
    %34 = vector.broadcast %33 : vector<1x16x128xf32> to vector<8x16x128xf32>
    %35 = arith.addf %31, %34 : vector<8x16x128xf32>
    %cst_14 = arith.constant dense<0xFF800000> : vector<8x128xf32>
    %36 = vector.multi_reduction <maximumf>, %35, %cst_14 [1] : vector<8x16x128xf32> to vector<8x128xf32>
    %37 = arith.truncf %36 : vector<8x128xf32> to vector<8x128xbf16>
    %c0_15 = arith.constant 0 : index
    %c0_16 = arith.constant 0 : index
    %38 = vector.load %arg5[%c0_15, %c0_16] : memref<128x128xbf16, #tpu.memory_space<vmem>>, vector<128x128xbf16>
    %cst_17 = arith.constant dense<0.000000e+00> : vector<8x128xf32>
    %39 = tpu.matmul %37, %38, %cst_17 {dimension_numbers = #tpu.dot_dimension_numbers<[1], [0], [0], [1], [0, 0, 1, 1], [], []>} : vector<8x128xbf16>, vector<128x128xbf16>, vector<8x128xf32> -> vector<8x128xf32>
    %c0_18 = arith.constant 0 : index
    %c0_19 = arith.constant 0 : index
    %40 = vector.load %arg6[%c0_18, %c0_19] : memref<1x128xf32, #tpu.memory_space<vmem>>, vector<1x128xf32>
    %41 = vector.broadcast %40 : vector<1x128xf32> to vector<8x128xf32>
    %42 = arith.addf %39, %41 : vector<8x128xf32>
    %c0_20 = arith.constant 0 : index
    %c0_21 = arith.constant 0 : index
    %43 = vector.load %arg7[%c0_20, %c0_21] : memref<8x128xf32, #tpu.memory_space<vmem>>, vector<8x128xf32>
    tpu.vector_store %arg7[%c0_20, %c0_21], %42 {strides = array<i32>} : memref<8x128xf32, #tpu.memory_space<vmem>>, vector<8x128xf32>,
    return
  }
  func.func @transform_0(%arg0: i32) -> (i32, i32, i32) {
    %c0_i32 = arith.constant 0 : i32
    %c0_i32_0 = arith.constant 0 : i32
    %c0_i32_1 = arith.constant 0 : i32
    return %arg0, %c0_i32, %c0_i32_0 : i32, i32, i32
  }
  func.func @transform_1(%arg0: i32) -> (i32, i32) {
    %c0_i32 = arith.constant 0 : i32
    %c0_i32_0 = arith.constant 0 : i32
    %c0_i32_1 = arith.constant 0 : i32
    return %c0_i32, %c0_i32_0 : i32, i32
  }
  func.func @transform_2(%arg0: i32) -> (i32, i32) {
    %c0_i32 = arith.constant 0 : i32
    %c0_i32_0 = arith.constant 0 : i32
    %c0_i32_1 = arith.constant 0 : i32
    return %c0_i32, %c0_i32_0 : i32, i32
  }
  func.func @transform_3(%arg0: i32) -> (i32, i32) {
    %c0_i32 = arith.constant 0 : i32
    %c0_i32_0 = arith.constant 0 : i32
    %c0_i32_1 = arith.constant 0 : i32
    return %c0_i32, %c0_i32_0 : i32, i32
  }
  func.func @transform_4(%arg0: i32) -> (i32, i32) {
    %c0_i32 = arith.constant 0 : i32
    %c0_i32_0 = arith.constant 0 : i32
    %c0_i32_1 = arith.constant 0 : i32
    return %c0_i32, %c0_i32_0 : i32, i32
  }
  func.func @transform_5(%arg0: i32) -> (i32, i32) {
    %c0_i32 = arith.constant 0 : i32
    %c0_i32_0 = arith.constant 0 : i32
    %c0_i32_1 = arith.constant 0 : i32
    return %c0_i32, %c0_i32_0 : i32, i32
  }
  func.func @transform_6(%arg0: i32) -> (i32, i32) {
    %c0_i32 = arith.constant 0 : i32
    %c0_i32_0 = arith.constant 0 : i32
    return %arg0, %c0_i32 : i32, i32
  }
}

</mosaic_0001>

<bundles_post_ra>
// kernel: tpu_custom_call.1
= control target key start
LH: loop header
LB: loop body
LE: loop exit
PB: predicated region body
PF: predicated region fallthrough
CT: control target
= control target key end

     0   :  { %11 = vsyncpa [#allocation3], 0  ;;  %s1832_s0 = inlined_call_operand.vmem [shape: s32[16,16,4], index: 0, kind: input, shape index: {}]   ;;  %s1833_s1 = inlined_call_operand.vmem [shape: bf16[128,128], index: 1, kind: input, shape index: {}]   ;;  %s1834_s2 = inlined_call_operand.vmem [shape: f32[1,128], index: 2, kind: input, shape index: {}]   ;;  %s1835_s3 = inlined_call_operand.vmem [shape: f32[16,128], index: 3, kind: input, shape index: {}]   ;;  %s1836_s4 = inlined_call_operand.vmem [shape: bf16[128,128], index: 4, kind: input, shape index: {}]   ;;  %s1837_s5 = inlined_call_operand.vmem [shape: f32[1,128], index: 5, kind: input, shape index: {}]   ;;  %s1838_s6 = inlined_call_operand.hbm [shape: f32[16,128], index: 6, kind: output, shape index: {}]  }
   0x1   :  { %13 = vsyncpa [#allocation3 + $0x1], 0  ;;  %s1380_s21 = smov 0   ;;  %s1382_s22 = smov 0  }
   0x2   :  { %s1384_s23 = smov 0   ;;  %s1386_s24 = smov 0  }
   0x3 LB: > { %s1401_s25 = sadd.s32 4294967295, %s1336_s24   ;;  %s1085_s26 = sadd.s32 4294967294, %s1336_s24   ;;  %s1336_s24 = sphi %s1386_s24, %s1844_s24   ;;  %s1332_s23 = sphi %s1384_s23, %s1843_s23   ;;  %s1328_s22 = sphi %s1382_s22, %s1842_s22   ;;  %s1324_s21 = sphi %s1380_s21, %s1841_s21  }
   0x4   : > { %s1405_s27 = sadd.s32 1, %s1336_s24   ;;  %s157_s28 = sadd.s32 1, %s1332_s23 }
   0x5   : > { %s154_s29 = ssub.s32 %s1336_s24, %s1405_s27  ;;  %p167_p0 = scmp.ne.s32.totalorder %s1332_s23, %s1328_s22 }
   0x6   : > { %p155_p1 = scmp.eq.s32.totalorder %s154_s29, 0  ;;  %p168_p2 = scmp.eq.s32.totalorder %s1401_s25, 1 }
   0x7   : > { %p173_p3 = scmp.ne.s32.totalorder %s1328_s22, %s1324_s21  ;;  %p174_p4 = scmp.eq.s32.totalorder %s1085_s26, 1 }
   0x8   : > { %s1416_s30 = scalar_select %p155_p1, %s1332_s23, %s157_s28  }
   0x9   : > { %p1418_p5 = por %p168_p2, %p167_p0  ;;  %p1422_p6 = por %p174_p4, %p173_p3 }
   0xa   : > { %p1088_p7 = scmp.ge.s32.totalorder %s1336_s24, 1  ;;  %p217_p8 = scmp.lt.s32.totalorder %s1336_s24, 3 }
   0xc   : > { %p218_p9 = pnand %p1088_p7, %p217_p8 }
   0xd   : > { %s1090_s9 = sshll.u32 (!%p218_p9), %s1401_s25, 3  ;;  %v1338_v0 = vmov (!%p218_p9), 0   ;;  %v1339_v1 = vmov (!%p218_p9), 0.0   ;;  %v1340_v8 = vmov (!%p218_p9), 1   ;;  %v1341_v10 = vmov (!%p218_p9), 2   ;;  %v1258_v18 = vld [vmem:[%s1833_s1] sm:$0xff] (!%p218_p9)  }
   0xe   : > { %221 = sbr.rel (%p218_p9) target bundleno = 795 (0x31b), region = 44  ;;  %1239 = vset.pattern.permute.xlu1 (!%p218_p9), %v1338_v0  ;;  %1238 = vset.pattern.permute.xlu0 (!%p218_p9), %v1338_v0  ;;  %p249_p10 = scmp.lt.s32.totalorder (!%p218_p9), %s1090_s9, 15  ;;  %v1342_v12 = vmov (!%p218_p9), 3   ;;  %v1259_v20 = vld [vmem:[%s1833_s1 + $0x8] sm:$0xff] (!%p218_p9)   ;;  %v1260_v21 = vld [vmem:[%s1833_s1 + $0x10] sm:$0xff] (!%p218_p9)   ;;  %v1261_v22 = vld [vmem:[%s1833_s1 + $0x18] sm:$0xff] (!%p218_p9)   ;;  %v272_v56 = vlaneseq (!%p218_p9) }
   0xf   : > { %1173 = vmatprep.subr.bf16.mxu1 (!%p218_p9), %v1339_v1  ;;  %1141 = vmatprep.subr.bf16.mxu0 (!%p218_p9), %v1258_v18  ;;  %v1262_v23 = vld [vmem:[%s1833_s1 + $0x20] sm:$0xff] (!%p218_p9)   ;;  %v1263_v24 = vld [vmem:[%s1833_s1 + $0x28] sm:$0xff] (!%p218_p9)   ;;  %v1264_v25 = vld [vmem:[%s1833_s1 + $0x30] sm:$0xff] (!%p218_p9)   ;;  %s245_s28 = sand.u32 (!%p218_p9), 1, %s1328_s22   ;;  %s1112_s11 = sshll.u32 (!%p218_p9), %s1401_s25, 7 }
  0x10   : > { %1142 = vmatpush3.bf16.msra.mxu0 (!%p218_p9), %v1258_v18  ;;  %v1265_v26 = vld [vmem:[%s1833_s1 + $0x38] sm:$0xff] (!%p218_p9)   ;;  %v1585_v59 = vand.u32 (!%p218_p9), 127, %v272_v56  ;;  %s1089_s29 = sshll.u32 (!%p218_p9), %s245_s28, 3  ;;  %s1790_s16 = scalar_lea.hbm (!%p218_p9), %s1838_s6, %s1112_s11 }
  0x11   : > { %1143 = vmatprep.subr.bf16.mxu0 (!%p218_p9), %v1259_v20  ;;  %s247_s12 = scalar_lea.vmem (!%p218_p9), [#allocation2], %s1089_s29  ;;  %s1013_s17 = scalar_lea.sflag (!%p218_p9), [#allocation3], %s245_s28 }
  0x12   : > { %s1026_s14 = sshll.u32 (!%p218_p9), %s247_s12, 4  ;;  %s1344_s18 = smov (!%p218_p9), [#allocation2]   ;;  %s1792_s14 = int_to_ptr.vmem [resolvable:$true] %s1026_s14 }
  0x13   : > { %s1274_s25 = scalar_lea.vmem (!%p218_p9), %s1792_s14, 128  ;;  %s1278_s19 = sshll.u32 (!%p218_p9), %s1344_s18, 4  ;;  %s1279_s19 = int_to_ptr.vmem [resolvable:$false] %s1278_s19 }
  0x14   : > { %1144 = vmatpush3.bf16.msra.mxu0 (!%p218_p9), %v1259_v20  ;;  %p1275_p11 = scmp.ne.s32.totalorder (!%p218_p9), %s1792_s14, %s1274_s25  ;;  %s1280_s20 = scalar_lea.vmem (!%p218_p9), %s1279_s19, 256 }
  0x15   : > { %s1846_s9 = smov (!%p249_p10, %s1090_s9), 15  ;;  %1145 = vmatprep.subr.bf16.mxu0 %v1260_v21  ;;  %p1281_p0 = scmp.lt.s32.totalorder %s1792_s14, %s1279_s19 }
  0x16   : > { %s1115_s10 = sshll.u32 %s1846_s9, 4  ;;  %p1276_p12 = pnand %p1275_p11, %p1418_p5 }
  0x17   : > { %s1435_s13 = scalar_lea.vmem %s1832_s0, %s1115_s10  ;;  %p1282_p1 = scmp.lt.s32.totalorder %s1280_s20, %s1274_s25 }
  0x18   : > { %v258_v2 = vld [vmem:[%s1435_s13 + $0x10] sm:$0xff]  ;;  %v1439_v3 = vld [vmem:[%s1435_s13] sm:$0xff]  ;;  %v1443_v4 = vld [vmem:[%s1435_s13 + $0x18] sm:$0xff]  ;;  %1146 = vmatpush3.bf16.msra.mxu0 %v1260_v21  ;;  %p1277_p13 = pneg %p1276_p12 }
  0x19   : > { %281 = vperm.xlu1 %1239, %v258_v2   ;;  %275 = vperm.xlu0 %1238, %v1439_v3   ;;  %v257_v5 = vld [vmem:[%s1435_s13 + $0x8] sm:$0xff]  ;;  %v260_v11 = vld [vmem:[%s1435_s13 + $0x20] sm:$0xff]  ;;  %v263_v13 = vld [vmem:[%s1435_s13 + $0x38] sm:$0xff]  ;;  %p1283_p2 = por %p1282_p1, %p1281_p0 }
  0x1a   : > { %v1448_v6 = vld [vmem:[%s1435_s13 + $0x28] sm:$0xff]  ;;  %v1470_v14 = vld [vmem:[%s1435_s13 + $0x40] sm:$0xff]  ;;  %v1474_v15 = vld [vmem:[%s1435_s13 + $0x58] sm:$0xff]  ;;  %1147 = vmatprep.subr.bf16.mxu0 %v1261_v22 }
  0x1b   : > { %v1451_v7 = vld [vmem:[%s1435_s13 + $0x48] sm:$0xff]  ;;  %v262_v16 = vld [vmem:[%s1435_s13 + $0x30] sm:$0xff]  ;;  %v1480_v17 = vld [vmem:[%s1435_s13 + $0x60] sm:$0xff]  ;;  %p1284_p3 = pnand %p1283_p2, %p1277_p13 }
  0x1c   : > { %v1457_v9 = vld [vmem:[%s1435_s13 + $0x68] sm:$0xff]  ;;  %v1487_v19 = vld [vmem:[%s1435_s13 + $0x78] sm:$0xff]  ;;  %1148 = vmatpush3.bf16.msra.mxu0 %v1261_v22  ;;  %v266_v27 = vld [vmem:[%s1435_s13 + $0x50] sm:$0xff] }
  0x1d   : > { %284 = vperm.xlu1 %1239, %v1443_v4   ;;  %278 = vperm.xlu0 %1238, %v257_v5   ;;  %v270_v30 = vld [vmem:[%s1435_s13 + $0x70] sm:$0xff] }
  0x1e   : > { %1149 = vmatprep.subr.bf16.mxu0 %v1262_v23 }
  0x20   : > { %1150 = vmatpush3.bf16.msra.mxu0 %v1262_v23 }
  0x21   : > { %1240 = vset.pattern.permute.xlu1 %v1340_v8  ;;  %290 = vperm.xlu0 %1238, %v1448_v6  }
  0x22   : > { %358 = vperm.xlu1 %1240, %v257_v5   ;;  %1151 = vmatprep.subr.bf16.mxu0 %v1263_v24 }
  0x24   : > { %1152 = vmatpush3.bf16.msra.mxu0 %v1263_v24 }
  0x25   : > { %302 = vperm.xlu0 %1238, %v1451_v7   ;;  %1153 = vmatprep.subr.bf16.mxu0 %v1264_v25 }
  0x26   : > { %361 = vperm.xlu1 %1240, %v258_v2  }
  0x28   : > { %1154 = vmatpush3.bf16.msra.mxu0 %v1264_v25 }
  0x29   : > { %314 = vperm.xlu0 %1238, %v1457_v9   ;;  %1155 = vmatprep.subr.bf16.mxu0 %v1265_v26 }
  0x2a   : > { %1241 = vset.pattern.permute.xlu1 %v1341_v10 }
  0x2b   : > { %435 = vperm.xlu1 %1241, %v1439_v3  }
  0x2c   : > { %1156 = vmatpush3.bf16.msra.mxu0 %v1265_v26 }
  0x2d   : > { %1252 = vset.pattern.permute.xlu0 %v1340_v8 }
  0x2e   : > { %355 = vperm.xlu0 %1252, %v1439_v3  }
  0x2f   : > { %441 = vperm.xlu1 %1241, %v258_v2  }
  0x32   : > { %364 = vperm.xlu0 %1252, %v1443_v4  }
  0x33   : > { %444 = vperm.xlu1 %1241, %v1443_v4  }
  0x36   : > { %367 = vperm.xlu0 %1252, %v260_v11  }
  0x37   : > { %1242 = vset.pattern.permute.xlu1 %v1342_v12 }
  0x38   : > { %518 = vperm.xlu1 %1242, %v257_v5  }
  0x3a   : > { %376 = vperm.xlu0 %1252, %v263_v13  }
  0x3c   : > { %521 = vperm.xlu1 %1242, %v258_v2  }
  0x3e   : > { %379 = vperm.xlu0 %1252, %v1470_v14  }
  0x40   : > { %1243 = vset.pattern.permute.xlu1 %v1338_v0 }
  0x41   : > { %287 = vperm.xlu1 %1243, %v260_v11  }
  0x42   : > { %388 = vperm.xlu0 %1252, %v1474_v15  }
  0x45   : > { %293 = vperm.xlu1 %1243, %v262_v16  }
  0x46   : > { %391 = vperm.xlu0 %1252, %v1480_v17  }
  0x49   : > { %296 = vperm.xlu1 %1243, %v263_v13  }
  0x4a   : > { %400 = vperm.xlu0 %1252, %v1487_v19  }
  0x4d   : > { %1244 = vset.pattern.permute.xlu1 %v1340_v8 }
  0x4e   : > { %370 = vperm.xlu1 %1244, %v1448_v6   ;;  %1254 = vset.pattern.permute.xlu0 %v1341_v10 }
  0x4f   : > { %438 = vperm.xlu0 %1254, %v257_v5  }
  0x52   : > { %373 = vperm.xlu1 %1244, %v262_v16  }
  0x53   : > { %450 = vperm.xlu0 %1254, %v1448_v6  }
  0x56   : > { %1245 = vset.pattern.permute.xlu1 %v1341_v10 }
  0x57   : > { %447 = vperm.xlu1 %1245, %v260_v11   ;;  %462 = vperm.xlu0 %1254, %v1451_v7  }
  0x5b   : > { %453 = vperm.xlu1 %1245, %v262_v16   ;;  %474 = vperm.xlu0 %1254, %v1457_v9  }
  0x5f   : > { %456 = vperm.xlu1 %1245, %v263_v13   ;;  %1256 = vset.pattern.permute.xlu0 %v1342_v12 }
  0x60   : > { %515 = vperm.xlu0 %1256, %v1439_v3  }
  0x63   : > { %1246 = vset.pattern.permute.xlu1 %v1342_v12 }
  0x64   : > { %530 = vperm.xlu1 %1246, %v1448_v6   ;;  %524 = vperm.xlu0 %1256, %v1443_v4  }
  0x68   : > { %533 = vperm.xlu1 %1246, %v262_v16   ;;  %527 = vperm.xlu0 %1256, %v260_v11  }
  0x6c   : > { %1247 = vset.pattern.permute.xlu1 %v1338_v0  ;;  %536 = vperm.xlu0 %1256, %v263_v13  }
  0x6d   : > { %299 = vperm.xlu1 %1247, %v1470_v14  }
  0x70   : > { %539 = vperm.xlu0 %1256, %v1470_v14  }
  0x71   : > { %305 = vperm.xlu1 %1247, %v266_v27  }
  0x74   : > { %548 = vperm.xlu0 %1256, %v1474_v15  }
  0x75   : > { %308 = vperm.xlu1 %1247, %v1474_v15  }
  0x78   : > { %551 = vperm.xlu0 %1256, %v1480_v17  }
  0x79   : > { %1248 = vset.pattern.permute.xlu1 %v1340_v8 }
  0x7a   : > { %382 = vperm.xlu1 %1248, %v1451_v7  }
  0x7c   : > { %560 = vperm.xlu0 %1256, %v1487_v19  }
  0x7e   : > { %385 = vperm.xlu1 %1248, %v266_v27  }
  0x82   : > { %1249 = vset.pattern.permute.xlu1 %v1341_v10 }
  0x83   : > { %459 = vperm.xlu1 %1249, %v1470_v14  }
  0x87   : > { %465 = vperm.xlu1 %1249, %v266_v27  }
  0x8b   : > { %468 = vperm.xlu1 %1249, %v1474_v15  }
  0x8f   : > { %1250 = vset.pattern.permute.xlu1 %v1342_v12 }
  0x90   : > { %542 = vperm.xlu1 %1250, %v1451_v7  }
  0x94   : > { %545 = vperm.xlu1 %1250, %v266_v27  }
  0x98   : > { %v1538_v28 = vpop.permute.xlu1 %281  ;;  %1251 = vset.pattern.permute.xlu1 %v1338_v0  ;;  %v276_v29 = vpop.permute.xlu0 %275 }
  0x99   : > { %311 = vperm.xlu1 %1251, %v1480_v17   ;;  %vm322_vm0 = vcmp.eq.s32.totalorder %v276_v29, %v1585_v59  ;;  %vm324_vm7 = vcmp.eq.s32.totalorder %v1538_v28, %v1585_v59 }
  0x9a   : > { %v338_v62 = vsel %vm322_vm0, 1.0, %v1339_v1  ;;  %v340_v11 = vsel %vm324_vm7, 1.0, %v1339_v1 }
  0x9c   : > { %v285_v31 = vpop.permute.xlu1 %284  ;;  %v279_v32 = vpop.permute.xlu0 %278 }
  0x9d   : > { %317 = vperm.xlu1 %1251, %v270_v30   ;;  %vm323_vm1 = vcmp.eq.s32.totalorder %v279_v32, %v1585_v59  ;;  %vm325_vm4 = vcmp.eq.s32.totalorder %v285_v31, %v1585_v59 }
  0x9e   : > { %v339_v63 = vsel %vm323_vm1, 1.0, %v1339_v1  ;;  %v341_v5 = vsel %vm325_vm4, 1.0, %v1339_v1 }
  0xa0   : > { %v1543_v33 = vpop.permute.xlu0 %290 }
  0xa1   : > { %v359_v34 = vpop.permute.xlu1 %358  ;;  %320 = vperm.xlu1 %1251, %v1487_v19   ;;  %vm327_vm9 = vcmp.eq.s32.totalorder %v1543_v33, %v1585_v59 }
  0xa2   : > { %vm403_vm3 = vcmp.eq.s32.totalorder %v359_v34, %v1585_v59  ;;  %v343_v16 = vsel %vm327_vm9, 1.0, %v1339_v1 }
  0xa3   : > { %v419_v4 = vsel %vm403_vm3, 1.0, %v339_v63 }
  0xa4   : > { %v1546_v35 = vpop.permute.xlu0 %302 }
  0xa5   : > { %v1548_v36 = vpop.permute.xlu1 %361  ;;  %1253 = vset.pattern.permute.xlu1 %v1340_v8 }
  0xa6   : > { %394 = vperm.xlu1 %1253, %v1457_v9   ;;  %vm404_vm10 = vcmp.eq.s32.totalorder %v1548_v36, %v1585_v59 }
  0xa7   : > { %v420_v14 = vsel %vm404_vm10, 1.0, %v340_v11 }
  0xa8   : > { %v1552_v37 = vpop.permute.xlu0 %314 }
  0xaa   : > { %397 = vperm.xlu1 %1253, %v270_v30   ;;  %v436_v38 = vpop.permute.xlu1 %435 }
  0xab   : > { %vm482_vm8 = vcmp.eq.s32.totalorder %v436_v38, %v1585_v59 }
  0xad   : > { %v356_v39 = vpop.permute.xlu0 %355 }
  0xae   : > { %1255 = vset.pattern.permute.xlu1 %v1341_v10  ;;  %v1555_v40 = vpop.permute.xlu1 %441  ;;  %vm402_vm2 = vcmp.eq.s32.totalorder %v356_v39, %v1585_v59 }
  0xaf   : > { %471 = vperm.xlu1 %1255, %v1480_v17   ;;  %v418_v3 = vsel %vm402_vm2, 1.0, %v338_v62  ;;  %vm484_vm11 = vcmp.eq.s32.totalorder %v1555_v40, %v1585_v59 }
  0xb0   : > { %v500_v17 = vsel %vm484_vm11, 1.0, %v420_v14 }
  0xb1   : > { %v365_v41 = vpop.permute.xlu0 %364 }
  0xb2   : > { %v445_v42 = vpop.permute.xlu1 %444  ;;  %vm405_vm6 = vcmp.eq.s32.totalorder %v365_v41, %v1585_v59 }
  0xb3   : > { %477 = vperm.xlu1 %1255, %v270_v30   ;;  %v421_v10 = vsel %vm405_vm6, 1.0, %v341_v5  ;;  %vm485_vm12 = vcmp.eq.s32.totalorder %v445_v42, %v1585_v59 }
  0xb4   : > { %v501_v18 = vsel %vm485_vm12, 1.0, %v421_v10 }
  0xb5   : > { %v1558_v43 = vpop.permute.xlu0 %367 }
  0xb6   : > { %vm406_vm1 = vcmp.eq.s32.totalorder %v1558_v43, %v1585_v59 }
  0xb7   : > { %480 = vperm.xlu1 %1255, %v1487_v19   ;;  %v519_v44 = vpop.permute.xlu1 %518 }
  0xb8   : > { %vm563_vm13 = vcmp.eq.s32.totalorder %v519_v44, %v1585_v59 }
  0xb9   : > { %v1561_v45 = vpop.permute.xlu0 %376 }
  0xba   : > { %vm409_vm7 = vcmp.eq.s32.totalorder %v1561_v45, %v1585_v59 }
  0xbb   : > { %1257 = vset.pattern.permute.xlu1 %v1342_v12  ;;  %v1564_v46 = vpop.permute.xlu1 %521 }
  0xbc   : > { %554 = vperm.xlu1 %1257, %v1457_v9   ;;  %v498_v9 = vsel %vm482_vm8, 1.0, %v418_v3  ;;  %vm564_vm0 = vcmp.eq.s32.totalorder %v1564_v46, %v1585_v59 }
  0xbd   : > { %v1567_v47 = vpop.permute.xlu0 %379  ;;  %v580_v22 = vsel %vm564_vm0, 1.0, %v500_v17 }
  0xc0   : > { %557 = vperm.xlu1 %1257, %v270_v30   ;;  %v288_v48 = vpop.permute.xlu1 %287 }
  0xc1   : > { %v1569_v49 = vpop.permute.xlu0 %388  ;;  %vm326_vm15 = vcmp.eq.s32.totalorder %v288_v48, %v1585_v59 }
  0xc2   : > { %v342_v21 = vsel %vm326_vm15, 1.0, %v1339_v1 }
  0xc3   : > { %v422_v27 = vsel %vm406_vm1, 1.0, %v342_v21  ;;  %vm331_vm1 = vcmp.eq.s32.totalorder %v1546_v35, %v1585_v59 }
  0xc4   : > { %v1571_v50 = vpop.permute.xlu1 %293  ;;  %v347_v62 = vsel %vm331_vm1, 1.0, %v1339_v1 }
  0xc5   : > { %v1573_v51 = vpop.permute.xlu0 %391  ;;  %vm328_vm9 = vcmp.eq.s32.totalorder %v1571_v50, %v1585_v59 }
  0xc6   : > { %v344_v34 = vsel %vm328_vm9, 1.0, %v1339_v1 }
  0xc8   : > { %v1575_v52 = vpop.permute.xlu1 %296 }
  0xc9   : > { %v1577_v53 = vpop.permute.xlu0 %400  ;;  %vm329_vm2 = vcmp.eq.s32.totalorder %v1575_v52, %v1585_v59 }
  0xca   : > { %v345_v25 = vsel %vm329_vm2, 1.0, %v1339_v1  ;;  %vm410_vm2 = vcmp.eq.s32.totalorder %v1567_v47, %v1585_v59 }
  0xcb   : > { %v425_v39 = vsel %vm409_vm7, 1.0, %v345_v25 }
  0xcd   : > { %v1579_v54 = vpop.permute.xlu1 %370 }
  0xce   : > { %v439_v55 = vpop.permute.xlu0 %438  ;;  %vm407_vm3 = vcmp.eq.s32.totalorder %v1579_v54, %v1585_v59 }
  0xcf   : > { %vm483_vm5 = vcmp.eq.s32.totalorder %v439_v55, %v1585_v59  ;;  %v423_v26 = vsel %vm407_vm3, 1.0, %v343_v16 }
  0xd0   : > { %v499_v6 = vsel %vm483_vm5, 1.0, %v419_v4 }
  0xd1   : > { %v1581_v57 = vpop.permute.xlu1 %373  ;;  %v579_v13 = vsel %vm563_vm13, 1.0, %v499_v6 }
  0xd2   : > { %v1583_v58 = vpop.permute.xlu0 %450  ;;  %vm408_vm10 = vcmp.eq.s32.totalorder %v1581_v57, %v1585_v59 }
  0xd3   : > { %vm487_vm5 = vcmp.eq.s32.totalorder %v1583_v58, %v1585_v59  ;;  %v424_v38 = vsel %vm408_vm10, 1.0, %v344_v34  ;;  %vm413_vm10 = vcmp.eq.s32.totalorder %v1569_v49, %v1585_v59 }
  0xd4   : > { %v503_v30 = vsel %vm487_vm5, 1.0, %v423_v26 }
  0xd6   : > { %v448_v60 = vpop.permute.xlu1 %447  ;;  %v1588_v61 = vpop.permute.xlu0 %462 }
  0xd7   : > { %vm486_vm6 = vcmp.eq.s32.totalorder %v448_v60, %v1585_v59 }
  0xd8   : > { %v502_v31 = vsel %vm486_vm6, 1.0, %v422_v27  ;;  %vm491_vm6 = vcmp.eq.s32.totalorder %v1588_v61, %v1585_v59 }
  0xda   : > { %v1595_v0 = vpop.permute.xlu1 %453  ;;  %v1597_v2 = vpop.permute.xlu0 %474 }
  0xdb   : > { %vm488_vm12 = vcmp.eq.s32.totalorder %v1595_v0, %v1585_v59 }
  0xdc   : > { %v504_v41 = vsel %vm488_vm12, 1.0, %v424_v38 }
  0xde   : > { %v457_v7 = vpop.permute.xlu1 %456 }
  0xdf   : > { %v516_v8 = vpop.permute.xlu0 %515  ;;  %vm489_vm13 = vcmp.eq.s32.totalorder %v457_v7, %v1585_v59 }
  0xe0   : > { %vm562_vm14 = vcmp.eq.s32.totalorder %v516_v8, %v1585_v59  ;;  %v505_v42 = vsel %vm489_vm13, 1.0, %v425_v39 }
  0xe1   : > { %v578_v12 = vsel %vm562_vm14, 1.0, %v498_v9 }
  0xe2   : > { %v594_v15 = vpack.c.bf16 %v579_v13, %v578_v12 }
  0xe3   : > { %v531_v19 = vpop.permute.xlu1 %530  ;;  %v525_v20 = vpop.permute.xlu0 %524 }
  0xe4   : > { %vm565_vm4 = vcmp.eq.s32.totalorder %v525_v20, %v1585_v59  ;;  %1157 = vmatprep.mubr.bf16.mxu0 %v594_v15  ;;  %vm567_vm8 = vcmp.eq.s32.totalorder %v531_v19, %v1585_v59 }
  0xe5   : > { %v581_v23 = vsel %vm565_vm4, 1.0, %v501_v18  ;;  %v583_v32 = vsel %vm567_vm8, 1.0, %v503_v30 }
  0xe6   : > { %v595_v24 = vpack.c.bf16 %v581_v23, %v580_v22 }
  0xe7   : > { %v534_v28 = vpop.permute.xlu1 %533  ;;  %v528_v29 = vpop.permute.xlu0 %527 }
  0xe8   : > { %vm566_vm11 = vcmp.eq.s32.totalorder %v528_v29, %v1585_v59  ;;  %1158 = vmatmul.mubr.bf16.vlgmr.msra.gmra.mrb[0].mxu0 %v595_v24  ;;  %vm568_vm14 = vcmp.eq.s32.totalorder %v534_v28, %v1585_v59 }
  0xe9   : > { %v582_v33 = vsel %vm566_vm11, 1.0, %v502_v31  ;;  %v584_v44 = vsel %vm568_vm14, 1.0, %v504_v41 }
  0xea   : > { %v596_v36 = vpack.c.bf16 %v583_v32, %v582_v33 }
  0xeb   : > { %v537_v40 = vpop.permute.xlu0 %536 }
  0xec   : > { %vm569_vm15 = vcmp.eq.s32.totalorder %v537_v40, %v1585_v59  ;;  %v300_v43 = vpop.permute.xlu1 %299  ;;  %1161 = vmatprep.mubr.bf16.mxu0 %v596_v36 }
  0xed   : > { %v585_v46 = vsel %vm569_vm15, 1.0, %v505_v42  ;;  %vm330_vm0 = vcmp.eq.s32.totalorder %v300_v43, %v1585_v59 }
  0xee   : > { %v597_v48 = vpack.c.bf16 %v585_v46, %v584_v44  ;;  %v346_v45 = vsel %vm330_vm0, 1.0, %v1339_v1  ;;  %vm335_vm0 = vcmp.eq.s32.totalorder %v1552_v37, %v1585_v59  ;;  %v1266_v44 = vld [vmem:[%s1836_s4] sm:$0xff]   ;;  %v1267_v46 = vld [vmem:[%s1836_s4 + $0x8] sm:$0xff]  }
  0xef   : > { %v540_v60 = vpop.permute.xlu0 %539  ;;  %v426_v35 = vsel %vm410_vm2, 1.0, %v346_v45  ;;  %v351_v20 = vsel %vm335_vm0, 1.0, %v1339_v1  ;;  %vm495_vm2 = vcmp.eq.s32.totalorder %v1597_v2, %v1585_v59  ;;  %1174 = vmatpush3.bf16.msra.mxu1 %v1266_v44  ;;  %vm1343_vm0 = vmmov 0  }
  0xf0   : > { %v306_v50 = vpop.permute.xlu1 %305  ;;  %1162 = vmatmul.mubr.bf16.gmra.mrb[4].mxu0 %v597_v48  ;;  %vm570_vm7 = vcmp.eq.s32.totalorder %v540_v60, %v1585_v59  ;;  %1175 = vmatprep.subr.bf16.mxu1 %v1339_v1  ;;  %v1269_v48 = vld [vmem:[%s1836_s4 + $0x18] sm:$0xff]  }
  0xf1   : > { %vm332_vm8 = vcmp.eq.s32.totalorder %v306_v50, %v1585_v59  ;;  %v1270_v50 = vld [vmem:[%s1836_s4 + $0x20] sm:$0xff]   ;;  %1189 = vmatprep.mubr.msk.bf16.mxu1 %vm1343_vm0, %v1339_v1 }
  0xf2   : > { %v348_v8 = vsel %vm332_vm8, 1.0, %v1339_v1 }
  0xf3   : > { %v549_v3 = vpop.permute.xlu0 %548  ;;  %1176 = vmatpush3.bf16.msra.mxu1 %v1267_v46 }
  0xf4   : > { %v309_v52 = vpop.permute.xlu1 %308  ;;  %vm573_vm14 = vcmp.eq.s32.totalorder %v549_v3, %v1585_v59  ;;  %1177 = vmatprep.subr.bf16.mxu1 %v1339_v1  ;;  %v1751_v3 = vld [vmem:[%s1835_s3 + $0x8] sm:$0xff] }
  0xf5   : > { %vm333_vm4 = vcmp.eq.s32.totalorder %v309_v52, %v1585_v59  ;;  %v1271_v52 = vld [vmem:[%s1836_s4 + $0x28] sm:$0xff]  }
  0xf6   : > { %v349_v0 = vsel %vm333_vm4, 1.0, %v1339_v1 }
  0xf7   : > { %v429_v6 = vsel %vm413_vm10, 1.0, %v349_v0  ;;  %v552_v28 = vpop.permute.xlu0 %551 }
  0xf8   : > { %vm574_vm10 = vcmp.eq.s32.totalorder %v552_v28, %v1585_v59 }
  0xf9   : > { %v383_v54 = vpop.permute.xlu1 %382 }
  0xfa   : > { %vm411_vm3 = vcmp.eq.s32.totalorder %v383_v54, %v1585_v59  ;;  %v1272_v54 = vld [vmem:[%s1836_s4 + $0x30] sm:$0xff]  }
  0xfb   : > { %v427_v63 = vsel %vm411_vm3, 1.0, %v347_v62  ;;  %v561_v31 = vpop.permute.xlu0 %560 }
  0xfc   : > { %v507_v5 = vsel %vm491_vm6, 1.0, %v427_v63  ;;  %vm414_vm6 = vcmp.eq.s32.totalorder %v1573_v51, %v1585_v59 }
  0xfd   : > { %v386_v55 = vpop.permute.xlu1 %385 }
  0xfe   : > { %vm412_vm11 = vcmp.eq.s32.totalorder %v386_v55, %v1585_v59  ;;  %v1273_v55 = vld [vmem:[%s1836_s4 + $0x38] sm:$0xff]  }
  0xff   : > { %v428_v11 = vsel %vm412_vm11, 1.0, %v348_v8 }
 0x102   : > { %v460_v56 = vpop.permute.xlu1 %459 }
 0x103   : > { %vm490_vm5 = vcmp.eq.s32.totalorder %v460_v56, %v1585_v59  ;;  %v1738_v56 = vld [vmem:[%s1834_s2] ss:$0 sm:$0xff] }
 0x104   : > { %v506_v47 = vsel %vm490_vm5, 1.0, %v426_v35 }
 0x105   : > { %v586_v61 = vsel %vm570_vm7, 1.0, %v506_v47 }
 0x106   : > { %v466_v57 = vpop.permute.xlu1 %465 }
 0x107   : > { %vm492_vm13 = vcmp.eq.s32.totalorder %v466_v57, %v1585_v59 }
 0x108   : > { %v508_v13 = vsel %vm492_vm13, 1.0, %v428_v11 }
 0x10a   : > { %v469_v58 = vpop.permute.xlu1 %468 }
 0x10b   : > { %vm493_vm9 = vcmp.eq.s32.totalorder %v469_v58, %v1585_v59 }
 0x10c   : > { %v509_v9 = vsel %vm493_vm9, 1.0, %v429_v6  ;;  %vm417_vm9 = vcmp.eq.s32.totalorder %v1577_v53, %v1585_v59 }
 0x10d   : > { %v589_v49 = vsel %vm573_vm14, 1.0, %v509_v9  ;;  %vm577_vm14 = vcmp.eq.s32.totalorder %v561_v31, %v1585_v59 }
 0x10f   : > { %v543_v4 = vpop.permute.xlu1 %542 }
 0x110   : > { %vm571_vm12 = vcmp.eq.s32.totalorder %v543_v4, %v1585_v59 }
 0x111   : > { %v587_v7 = vsel %vm571_vm12, 1.0, %v507_v5 }
 0x112   : > { %v598_v10 = vpack.c.bf16 %v587_v7, %v586_v61 }
 0x113   : > { %v546_v12 = vpop.permute.xlu1 %545 }
 0x114   : > { %vm572_vm15 = vcmp.eq.s32.totalorder %v546_v12, %v1585_v59  ;;  %1165 = vmatprep.mubr.bf16.mxu0 %v598_v10 }
 0x115   : > { %v588_v14 = vsel %vm572_vm15, 1.0, %v508_v13 }
 0x116   : > { %v599_v15 = vpack.c.bf16 %v589_v49, %v588_v14 }
 0x118   : > { %v312_v16 = vpop.permute.xlu1 %311  ;;  %1166 = vmatmul.mubr.bf16.gmra.mrb[8].mxu0 %v599_v15 }
 0x119   : > { %vm334_vm3 = vcmp.eq.s32.totalorder %v312_v16, %v1585_v59 }
 0x11a   : > { %v350_v26 = vsel %vm334_vm3, 1.0, %v1339_v1  ;;  %vm911_vm3 = vcmask 1043459  }
 0x11b   : > { %v430_v37 = vsel %vm414_vm6, 1.0, %v350_v26  ;;  %vm917_vm6 = vcmask 1046534  }
 0x11c   : > { %v318_v17 = vpop.permute.xlu1 %317 }
 0x11d   : > { %vm336_vm7 = vcmp.eq.s32.totalorder %v318_v17, %v1585_v59 }
 0x11e   : > { %v352_v34 = vsel %vm336_vm7, 1.0, %v1339_v1  ;;  %vm919_vm7 = vcmask 1047559  }
 0x120   : > { %v321_v18 = vpop.permute.xlu1 %320 }
 0x121   : > { %vm337_vm4 = vcmp.eq.s32.totalorder %v321_v18, %v1585_v59 }
 0x122   : > { %v353_v2 = vsel %vm337_vm4, 1.0, %v1339_v1  ;;  %vm913_vm4 = vcmask 1044484  }
 0x123   : > { %v433_v32 = vsel %vm417_vm9, 1.0, %v353_v2 }
 0x125   : > { %v395_v19 = vpop.permute.xlu1 %394 }
 0x126   : > { %vm415_vm1 = vcmp.eq.s32.totalorder %v395_v19, %v1585_v59 }
 0x127   : > { %v431_v21 = vsel %vm415_vm1, 1.0, %v351_v20  ;;  %vm907_vm1 = vcmask 1041409  }
 0x128   : > { %v511_v22 = vsel %vm495_vm2, 1.0, %v431_v21  ;;  %vm909_vm2 = vcmask 1042434  }
 0x129   : > { %v398_v23 = vpop.permute.xlu1 %397 }
 0x12a   : > { %vm416_vm11 = vcmp.eq.s32.totalorder %v398_v23, %v1585_v59 }
 0x12b   : > { %v432_v39 = vsel %vm416_vm11, 1.0, %v352_v34 }
 0x12e   : > { %v472_v24 = vpop.permute.xlu1 %471 }
 0x12f   : > { %vm494_vm5 = vcmp.eq.s32.totalorder %v472_v24, %v1585_v59 }
 0x130   : > { %v510_v29 = vsel %vm494_vm5, 1.0, %v430_v37  ;;  %vm915_vm5 = vcmask 1045509  }
 0x131   : > { %v590_v51 = vsel %vm574_vm10, 1.0, %v510_v29 }
 0x132   : > { %v478_v25 = vpop.permute.xlu1 %477 }
 0x133   : > { %vm496_vm13 = vcmp.eq.s32.totalorder %v478_v25, %v1585_v59 }
 0x134   : > { %v512_v53 = vsel %vm496_vm13, 1.0, %v432_v39 }
 0x136   : > { %v481_v27 = vpop.permute.xlu1 %480 }
 0x137   : > { %vm497_vm8 = vcmp.eq.s32.totalorder %v481_v27, %v1585_v59 }
 0x138   : > { %v513_v36 = vsel %vm497_vm8, 1.0, %v433_v32 }
 0x139   : > { %v593_v41 = vsel %vm577_vm14, 1.0, %v513_v36 }
 0x13b   : > { %v555_v30 = vpop.permute.xlu1 %554 }
 0x13c   : > { %vm575_vm12 = vcmp.eq.s32.totalorder %v555_v30, %v1585_v59 }
 0x13d   : > { %v591_v33 = vsel %vm575_vm12, 1.0, %v511_v22 }
 0x13e   : > { %v600_v38 = vpack.c.bf16 %v591_v33, %v590_v51 }
 0x13f   : > { %v558_v40 = vpop.permute.xlu1 %557 }
 0x140   : > { %vm576_vm15 = vcmp.eq.s32.totalorder %v558_v40, %v1585_v59  ;;  %1169 = vmatprep.mubr.bf16.mxu0 %v600_v38  ;;  %v1268_v59 = vld [vmem:[%s1836_s4 + $0x10] sm:$0xff]  }
 0x141   : > { %v592_v42 = vsel %vm576_vm15, 1.0, %v512_v53  ;;  %1178 = vmatpush3.bf16.msra.mxu1 %v1268_v59 }
 0x142   : > { %v601_v43 = vpack.c.bf16 %v593_v41, %v592_v42  ;;  %1179 = vmatprep.subr.bf16.mxu1 %v1339_v1 }
 0x144   : > { %1170 = vmatmul.mubr.bf16.gmra.mrb[12].mxu0 %v601_v43 }
 0x145   : > { %1180 = vmatpush3.bf16.msra.mxu1 %v1269_v48 }
 0x146   : > { %1181 = vmatprep.subr.bf16.mxu1 %v1339_v1 }
 0x149   : > { %1182 = vmatpush3.bf16.msra.mxu1 %v1270_v50 }
 0x14a   : > { %1183 = vmatprep.subr.bf16.mxu1 %v1339_v1 }
 0x14d   : > { %1184 = vmatpush3.bf16.msra.mxu1 %v1271_v52 }
 0x14e   : > { %1185 = vmatprep.subr.bf16.mxu1 %v1339_v1 }
 0x151   : > { %1186 = vmatpush3.bf16.msra.mxu1 %v1272_v54 }
 0x152   : > { %1187 = vmatprep.subr.bf16.mxu1 %v1339_v1  ;;  %v1746_v1 = vld [vmem:[%s1835_s3] sm:$0xff] }
 0x155   : > { %1188 = vmatpush3.bf16.msra.mxu1 %v1273_v55 }
 0x1bb   : > { %v1159_v57 = vpop.f32.mrb[0].mxu0 }
 0x1bc   : > { %v716_v45 = vadd.f32 %v1159_v57, %v1738_v56  ;;  %v707_v58 = vpop.f32.mrb[1].mxu0 }
 0x1bd   : > { %v708_v60 = vadd.f32 %v1738_v56, %v707_v58  ;;  %v1160_v62 = vpop.f32.mrb[2].mxu0 }
 0x1be   : > { %v772_v63 = vmax.f32 %v716_v45, 0.0  ;;  %v719_v35 = vadd.f32 %v1160_v62, %v1738_v56  ;;  %v710_v0 = vpop.f32.mrb[3].mxu0 }
 0x1bf   : > { %v770_v47 = vmax.f32 %v708_v60, 0.0  ;;  %v711_v4 = vadd.f32 %v1738_v56, %v710_v0 }
 0x1c0   : > { %v773_v5 = vmax.f32 %v719_v35, 0.0  ;;  %v790_v6 = vadd.f32 %v1746_v1, %v772_v63 }
 0x1c1   : > { %v771_v61 = vmax.f32 %v711_v4, 0.0  ;;  %v788_v8 = vadd.f32 %v1746_v1, %v770_v47 }
 0x1c2   : > { %v791_v7 = vadd.f32 %v1751_v3, %v773_v5 }
 0x1c3   : > { %v789_v9 = vadd.f32 %v1751_v3, %v771_v61  ;;  %v1163_v10 = vpop.f32.mrb[4].mxu0 }
 0x1c4   : > { %v811_v11 = vmax.f32 %v790_v6, %v791_v7  ;;  %v732_v12 = vadd.f32 %v1163_v10, %v1738_v56  ;;  %v723_v13 = vpop.f32.mrb[5].mxu0 }
 0x1c5   : > { %v804_v49 = vmax.f32 %v788_v8, %v789_v9  ;;  %v724_v14 = vadd.f32 %v1738_v56, %v723_v13  ;;  %v1164_v15 = vpop.f32.mrb[6].mxu0 }
 0x1c6   : > { %v812_v16 = vrot.slane %v811_v11, 4  ;;  %v776_v17 = vmax.f32 %v732_v12, 0.0  ;;  %v735_v18 = vadd.f32 %v1164_v15, %v1738_v56  ;;  %v726_v19 = vpop.f32.mrb[7].mxu0 }
 0x1c7   : > { %v805_v20 = vrot.slane %v804_v49, 4  ;;  %v774_v21 = vmax.f32 %v724_v14, 0.0  ;;  %v727_v22 = vadd.f32 %v1738_v56, %v726_v19 }
 0x1c8   : > { %v813_v23 = vmax.f32 %v811_v11, %v812_v16  ;;  %v777_v24 = vmax.f32 %v735_v18, 0.0  ;;  %v794_v28 = vadd.f32 %v1746_v1, %v776_v17 }
 0x1c9   : > { %v806_v25 = vmax.f32 %v804_v49, %v805_v20  ;;  %v775_v26 = vmax.f32 %v727_v22, 0.0  ;;  %v792_v29 = vadd.f32 %v1746_v1, %v774_v21 }
 0x1ca   : > { %v814_v27 = vrot.slane %v813_v23, 2  ;;  %v795_v37 = vadd.f32 %v1751_v3, %v777_v24 }
 0x1cb   : > { %v807_v2 = vrot.slane %v806_v25, 2  ;;  %v793_v30 = vadd.f32 %v1751_v3, %v775_v26 }
 0x1cc   : > { %v815_v31 = vmax.f32 %v813_v23, %v814_v27  ;;  %v825_v51 = vmax.f32 %v794_v28, %v795_v37 }
 0x1cd   : > { %v808_v32 = vmax.f32 %v806_v25, %v807_v2  ;;  %v818_v33 = vmax.f32 %v792_v29, %v793_v30 }
 0x1ce   : > { %v816_v34 = vrot.slane %v815_v31, 1  ;;  %v826_v36 = vrot.slane %v825_v51, 4 }
 0x1cf   : > { %v809_v38 = vrot.slane %v808_v32, 1  ;;  %v819_v39 = vrot.slane %v818_v33, 4 }
 0x1d0   : > { %v817_v40 = vmax.f32 %v815_v31, %v816_v34  ;;  %v827_v53 = vmax.f32 %v825_v51, %v826_v36 }
 0x1d1   : > { %v810_v41 = vmax.f32 %v808_v32, %v809_v38  ;;  %v820_v42 = vmax.f32 %v818_v33, %v819_v39 }
 0x1d2   : > { %v861_v43 = vpack.c.bf16 %v817_v40, %v817_v40  ;;  %v828_v44 = vrot.slane %v827_v53, 2 }
 0x1d3   : > { %v860_v46 = vpack.c.bf16 %v810_v41, %v810_v41  ;;  %v821_v59 = vrot.slane %v820_v42, 2 }
 0x1d4   : > { %v900_v48 = vunpack.c.l.b16 %v861_v43  ;;  %v829_v50 = vmax.f32 %v827_v53, %v828_v44 }
 0x1d5   : > { %v899_v52 = vunpack.c.l.b16 %v860_v46  ;;  %v822_v54 = vmax.f32 %v820_v42, %v821_v59 }
 0x1d6   : > { %v830_v55 = vrot.slane %v829_v50, 1 }
 0x1d7   : > { %v908_v57 = vsel %vm907_vm1, %v900_v48, %v899_v52  ;;  %v823_v45 = vrot.slane %v822_v54, 1 }
 0x1d8   : > { %v831_v58 = vmax.f32 %v829_v50, %v830_v55 }
 0x1d9   : > { %v824_v60 = vmax.f32 %v822_v54, %v823_v45 }
 0x1da   : > { %v863_v62 = vpack.c.bf16 %v831_v58, %v831_v58 }
 0x1db   : > { %v862_v63 = vpack.c.bf16 %v824_v60, %v824_v60 }
 0x1dc   : > { %v902_v0 = vunpack.c.l.b16 %v863_v62 }
 0x1dd   : > { %v901_v35 = vunpack.c.l.b16 %v862_v63 }
 0x1df   : > { %v910_v47 = vsel %vm909_vm2, %v901_v35, %v908_v57 }
 0x1e0   : > { %v912_v4 = vsel %vm911_vm3, %v902_v0, %v910_v47 }
 0x1eb   : > { %v1167_v5 = vpop.f32.mrb[8].mxu0 }
 0x1ec   : > { %v748_v61 = vadd.f32 %v1167_v5, %v1738_v56  ;;  %v739_v6 = vpop.f32.mrb[9].mxu0 }
 0x1ed   : > { %v740_v7 = vadd.f32 %v1738_v56, %v739_v6  ;;  %v1168_v8 = vpop.f32.mrb[10].mxu0 }
 0x1ee   : > { %v780_v9 = vmax.f32 %v748_v61, 0.0  ;;  %v751_v10 = vadd.f32 %v1168_v8, %v1738_v56  ;;  %v742_v11 = vpop.f32.mrb[11].mxu0 }
 0x1ef   : > { %v778_v12 = vmax.f32 %v740_v7, 0.0  ;;  %v743_v13 = vadd.f32 %v1738_v56, %v742_v11 }
 0x1f0   : > { %v781_v49 = vmax.f32 %v751_v10, 0.0  ;;  %v798_v15 = vadd.f32 %v1746_v1, %v780_v9 }
 0x1f1   : > { %v779_v14 = vmax.f32 %v743_v13, 0.0  ;;  %v796_v17 = vadd.f32 %v1746_v1, %v778_v12  ;;  %v1102_v13 = vld [vmem:[%s1837_s5] ss:$0 sm:$0xff] }
 0x1f2   : > { %v799_v16 = vadd.f32 %v1751_v3, %v781_v49 }
 0x1f3   : > { %v797_v18 = vadd.f32 %v1751_v3, %v779_v14 }
 0x1f4   : > { %v839_v19 = vmax.f32 %v798_v15, %v799_v16 }
 0x1f5   : > { %v832_v20 = vmax.f32 %v796_v17, %v797_v18 }
 0x1f6   : > { %v840_v21 = vrot.slane %v839_v19, 4 }
 0x1f7   : > { %v833_v22 = vrot.slane %v832_v20, 4 }
 0x1f8   : > { %v841_v23 = vmax.f32 %v839_v19, %v840_v21 }
 0x1f9   : > { %v834_v24 = vmax.f32 %v832_v20, %v833_v22 }
 0x1fa   : > { %v842_v25 = vrot.slane %v841_v23, 2 }
 0x1fb   : > { %v835_v26 = vrot.slane %v834_v24, 2 }
 0x1fc   : > { %v843_v27 = vmax.f32 %v841_v23, %v842_v25 }
 0x1fd   : > { %v836_v28 = vmax.f32 %v834_v24, %v835_v26 }
 0x1fe   : > { %v844_v37 = vrot.slane %v843_v27, 1 }
 0x1ff   : > { %v837_v2 = vrot.slane %v836_v28, 1 }
 0x200   : > { %v845_v29 = vmax.f32 %v843_v27, %v844_v37 }
 0x201   : > { %v838_v30 = vmax.f32 %v836_v28, %v837_v2 }
 0x202   : > { %v865_v31 = vpack.c.bf16 %v845_v29, %v845_v29 }
 0x203   : > { %v864_v51 = vpack.c.bf16 %v838_v30, %v838_v30 }
 0x204   : > { %v904_v33 = vunpack.c.l.b16 %v865_v31 }
 0x205   : > { %v903_v32 = vunpack.c.l.b16 %v864_v51 }
 0x207   : > { %v914_v34 = vsel %vm913_vm4, %v903_v32, %v912_v4 }
 0x208   : > { %v916_v36 = vsel %vm915_vm5, %v904_v33, %v914_v34 }
 0x217   : > { %v1171_v38 = vpop.f32.mrb[12].mxu0 }
 0x218   : > { %v764_v39 = vadd.f32 %v1171_v38, %v1738_v56  ;;  %v755_v40 = vpop.f32.mrb[13].mxu0 }
 0x219   : > { %v756_v53 = vadd.f32 %v1738_v56, %v755_v40  ;;  %v1172_v41 = vpop.f32.mrb[14].mxu0 }
 0x21a   : > { %v784_v42 = vmax.f32 %v764_v39, 0.0  ;;  %v767_v43 = vadd.f32 %v1172_v41, %v1738_v56  ;;  %v758_v44 = vpop.f32.mrb[15].mxu0 }
 0x21b   : > { %v782_v46 = vmax.f32 %v756_v53, 0.0  ;;  %v759_v59 = vadd.f32 %v1738_v56, %v758_v44 }
 0x21c   : > { %v785_v48 = vmax.f32 %v767_v43, 0.0  ;;  %v802_v52 = vadd.f32 %v1746_v1, %v784_v42 }
 0x21d   : > { %v783_v50 = vmax.f32 %v759_v59, 0.0  ;;  %v800_v55 = vadd.f32 %v1746_v1, %v782_v46 }
 0x21e   : > { %v803_v54 = vadd.f32 %v1751_v3, %v785_v48 }
 0x21f   : > { %v801_v57 = vadd.f32 %v1751_v3, %v783_v50 }
 0x220   : > { %v853_v45 = vmax.f32 %v802_v52, %v803_v54 }
 0x221   : > { %v846_v58 = vmax.f32 %v800_v55, %v801_v57 }
 0x222   : > { %v854_v60 = vrot.slane %v853_v45, 4 }
 0x223   : > { %v847_v62 = vrot.slane %v846_v58, 4 }
 0x224   : > { %v855_v63 = vmax.f32 %v853_v45, %v854_v60 }
 0x225   : > { %v848_v35 = vmax.f32 %v846_v58, %v847_v62 }
 0x226   : > { %v856_v0 = vrot.slane %v855_v63, 2 }
 0x227   : > { %v849_v47 = vrot.slane %v848_v35, 2 }
 0x228   : > { %v857_v4 = vmax.f32 %v855_v63, %v856_v0 }
 0x229   : > { %v850_v56 = vmax.f32 %v848_v35, %v849_v47 }
 0x22a   : > { %v858_v5 = vrot.slane %v857_v4, 1 }
 0x22b   : > { %v851_v61 = vrot.slane %v850_v56, 1 }
 0x22c   : > { %v859_v6 = vmax.f32 %v857_v4, %v858_v5 }
 0x22d   : > { %v852_v7 = vmax.f32 %v850_v56, %v851_v61 }
 0x22e   : > { %v867_v8 = vpack.c.bf16 %v859_v6, %v859_v6 }
 0x22f   : > { %v866_v1 = vpack.c.bf16 %v852_v7, %v852_v7 }
 0x230   : > { %v906_v9 = vunpack.c.l.b16 %v867_v8 }
 0x231   : > { %v905_v3 = vunpack.c.l.b16 %v866_v1 }
 0x233   : > { %v918_v10 = vsel %vm917_vm6, %v905_v3, %v916_v36 }
 0x234   : > { %v920_v11 = vsel %vm919_vm7, %v906_v9, %v918_v10 }
 0x235   : > { %v921_v12 = vpack.c.b16 %v920_v11, %v920_v11 }
 0x237   : > { %1190 = vmatmul.mubr.bf16.vlgmr.msra.gmra.mrb[0].mxu1 %v921_v12 }
 0x30a   : > { %v1005_v49 = vpop.f32.mrb[0].mxu1 }
 0x30b   : > { %v1006_v14 = vadd.f32 %v1102_v13, %v1005_v49  ;;  %v1191_v15 = vpop.f32.mrb[1].mxu1 }
 0x30c   : > { %v1008_v16 = vpop.f32.mrb[2].mxu1 }
 0x30d   : > { %1011 = vst [vmem:[%s247_s12] sm:$0xff] %v1006_v14  ;;  %v1192_v17 = vpop.f32.mrb[3].mxu1 }
 0x30e   : > { %1287 = shalt.err (!%p1284_p3)
}
 0x30f   : > { %s1288_s26 = scalar_lea.hbm %s1790_s16, 128  ;;  %s1292_s9 = scalar_lea.hbm %s1838_s6, 256 }
 0x310   : > { %p1289_p4 = scmp.ne.s32.totalorder %s1790_s16, %s1288_s26  ;;  %p1293_p9 = scmp.lt.u32.totalorder %s1790_s16, %s1838_s6 }
 0x311   : > { %p1294_p10 = scmp.lt.u32.totalorder %s1292_s9, %s1288_s26  ;;  %p1296_p12 = scmp.lt.u32.totalorder %s1288_s26, %s1790_s16 }
 0x312   : > { %p1290_p7 = pnand %p1289_p4, %p1418_p5 }
 0x313   : > { %p1295_p11 = por %p1294_p10, %p1293_p9 }
 0x314   : > { %p1291_p8 = pneg %p1290_p7 }
 0x315   : > { %p1297_p13 = por %p1296_p12, %p1295_p11 }
 0x317   : > { %p1298_p0 = pnand %p1297_p13, %p1291_p8 }
 0x319   : > { %1301 = shalt.err (!%p1298_p0)
}
 0x31a   : > { %1193 = dma.vmem_to_hbm [thread:$0]  (%p1418_p5), %s1792_s14, 128, %s1790_s16, %s1013_s17  }
 0x31b PF: > { %p1199_p1 = scmp.ge.s32.totalorder %s1336_s24, 2  ;;  %s1038_s12 = sand.u32 1, %s1324_s21  }
 0x31c   : > { %s1039_s15 = scalar_lea.sflag [#allocation3], %s1038_s12 }
 0x31d   : > { %p1196_p2 = pnand %p1199_p1, %p1422_p6 }
 0x31f   : > { %1319 = dma.done.wait (!%p1196_p2), %s1039_s15, 128  }
 0x320   : > { %1321 = vsyncadd (!%p1196_p2), %s1039_s15, 4294967168  ;;  %p16_p3 = scmp.ge.s32.totalorder %s1405_s27, 4   ;;  %s1841_s21 = smov %s1328_s22 }
 0x321   : > { %s1842_s22 = smov %s1332_s23  ;;  %s1843_s23 = smov %s1416_s30 }
 0x322   : > { %s1844_s24 = smov %s1405_s27  ;;  %18 = sbr.rel (!%p16_p3) target bundleno = 3 (0x3), region = 79 }
 0x329   :  { %1044 = vsyncpa [#allocation3], 1 }
 0x32a   :  { %1046 = vsyncpa [#allocation3 + $0x1], 1 }

</bundles_post_ra>
